<compile_context>
chip_gen: v7x
topology: tpu7x:2x2x1
jax: 0.10.0
libtpu: 0.0.40
codegen_flags: <defaults>
</compile_context>

<pallas_src>
import functools

import jax
import jax.numpy as jnp
from jax.experimental import pallas as pl
from jax.experimental.pallas import tpu as pltpu

HIDDEN = 100      # logical hidden width (torch.nn.Linear(..., 100))
LANE = 128        # TPU lane width; hidden/output dims are padded to this
SUB = 8           # f32 sublane quantum (batch-row quantum)
W_ALIGN = 16      # bf16 sublane-tile row quantum for weight-slab sections
TB_CAP = 256      # max batch-tile rows


def _round_up(n, m):
    return -(-n // m) * m


def _num_tensorcores():
    """Best-effort count of TensorCores behind one JAX device (megacore chips)."""
    try:
        kind = jax.devices()[0].device_kind.lower()
    except Exception:
        return 1
    return 2 if any(tag in kind for tag in ("v4", "v5p", "v7")) else 1


def _plan(batch, num_tc):
    """Pick (batch_pad, batch_tile) for a 1-D 'parallel' grid."""
    n_steps = 2 if (num_tc >= 2 and batch >= 32) else 1
    while True:
        quant = SUB * n_steps
        if batch > 64:                      # coarser buckets -> fewer recompiles
            quant = max(quant, 64)
        batch_pad = _round_up(batch, quant)
        tb = batch_pad // n_steps           # always a multiple of 8
        if tb <= TB_CAP:
            return batch_pad, tb
        n_steps *= 2


# ----------------------------------------------------------------------------
# Parameter packing: one bf16 weight slab + one f32 bias block.
# ----------------------------------------------------------------------------
def pack_params(params):
    """Layout (all zero-padded to 128 lanes, weights stored [in, out]):
         w_slab[0           : in_pad]        = W1   (in_dim x HIDDEN real)
         w_slab[in_pad      : in_pad + 128]  = W2   (HIDDEN x HIDDEN real)
         w_slab[in_pad + 128: in_pad + 256]  = W3   (HIDDEN x out_dim real)
         b_blk rows 0 / 1 / 2                = b1 / b2 / b3   (f32)
    """
    w1, b1, w2, b2, w3, b3 = params
    in_dim, hid = w1.shape
    out_dim = w3.shape[1]
    assert hid <= LANE and out_dim <= LANE and in_dim <= LANE
    in_pad = _round_up(in_dim, W_ALIGN)

    def pad_w(w, rows):
        w = jnp.asarray(w, jnp.float32)
        blk = jnp.zeros((rows, LANE), jnp.float32)
        return blk.at[: w.shape[0], : w.shape[1]].set(w)

    w_slab = jnp.concatenate(
        [pad_w(w1, in_pad), pad_w(w2, LANE), pad_w(w3, LANE)], axis=0
    ).astype(jnp.bfloat16)                               # (in_pad + 256, 128)

    b_blk = jnp.zeros((SUB, LANE), jnp.float32)
    for r, b in enumerate((b1, b2, b3)):
        b_blk = b_blk.at[r, : b.shape[0]].set(jnp.asarray(b, jnp.float32))

    meta = dict(in_dim=in_dim, out_dim=out_dim, in_pad=in_pad,
                rows=w_slab.shape[0])
    return (w_slab, b_blk), meta


# ----------------------------------------------------------------------------
# Kernel: three aligned bf16 MXU matmuls with f32 accumulation + f32 epilogues.
# ----------------------------------------------------------------------------
def _make_kernel(in_pad):
    w2_off = in_pad
    w3_off = in_pad + LANE

    def kernel(x_ref, w_ref, b_ref, o_ref):
        x = x_ref[...].astype(jnp.bfloat16)                       # (tb, in_pad)

        h = jnp.dot(x, w_ref[0:in_pad, :],
                    preferred_element_type=jnp.float32) + b_ref[0:1, :]
        h = jnp.maximum(h, 0.0).astype(jnp.bfloat16)              # (tb, 128)

        h = jnp.dot(h, w_ref[w2_off:w2_off + LANE, :],
                    preferred_element_type=jnp.float32) + b_ref[1:2, :]
        h = jnp.maximum(h, 0.0).astype(jnp.bfloat16)

        out = jnp.dot(h, w_ref[w3_off:w3_off + LANE, :],
                      preferred_element_type=jnp.float32) + b_ref[2:3, :]
        o_ref[...] = out.astype(o_ref.dtype)                      # lane-dense (tb, 128)

    return kernel


# ----------------------------------------------------------------------------
# Wrapper: pad + pallas_call + slice, all inside one jit.
# ----------------------------------------------------------------------------
def make_network_forward(params):
    (w_slab, b_blk), meta = pack_params(params)
    in_dim, out_dim = meta["in_dim"], meta["out_dim"]
    in_pad, rows = meta["in_pad"], meta["rows"]
    num_tc = _num_tensorcores()
    kernel = _make_kernel(in_pad)

    @functools.partial(jax.jit, static_argnames=("batch_pad", "tb"))
    def _fwd(x, w_slab, b_blk, *, batch_pad, tb):
        batch = x.shape[0]
        xp = jnp.zeros((batch_pad, in_pad), jnp.float32)
        xp = xp.at[:batch, :in_dim].set(x.astype(jnp.float32))
        out = pl.pallas_call(
            kernel,
            out_shape=jax.ShapeDtypeStruct((batch_pad, LANE), jnp.float32),
            grid_spec=pltpu.PrefetchScalarGridSpec(
                num_scalar_prefetch=0,
                grid=(batch_pad // tb,),
                in_specs=[
                    # batch tile marches over the grid
                    pl.BlockSpec((tb, in_pad), lambda i: (i, 0)),
                    # same block every step -> weight slab stays VMEM-resident
                    pl.BlockSpec((rows, LANE), lambda i: (0, 0)),
                    pl.BlockSpec((SUB, LANE), lambda i: (0, 0)),
                ],
                out_specs=pl.BlockSpec((tb, LANE), lambda i: (i, 0)),
            ),
            compiler_params=pltpu.CompilerParams(
                dimension_semantics=("parallel",),
            ),
        )(xp, w_slab, b_blk)
        return out[:batch, :out_dim]

    def forward(x):
        squeeze = (x.ndim == 1)
        if squeeze:
            x = x[None, :]
        batch_pad, tb = _plan(x.shape[0], num_tc)
        out = _fwd(x, w_slab, b_blk, batch_pad=batch_pad, tb=tb)
        return out[0] if squeeze else out

    return forward


# ----------------------------------------------------------------------------
# Init (mirrors torch.nn.Linear default: U[-1/sqrt(fan_in), 1/sqrt(fan_in)])
# ----------------------------------------------------------------------------
def init_params(key, input_dimension, output_dimension):
    ks = jax.random.split(key, 6)

    def linear(kw, kb, fan_in, fan_out):
        bound = 1.0 / jnp.sqrt(jnp.float32(fan_in))
        # weights stored as [in, out] so the kernel computes x @ W
        w = jax.random.uniform(kw, (fan_in, fan_out), jnp.float32, -bound, bound)
        b = jax.random.uniform(kb, (fan_out,), jnp.float32, -bound, bound)
        return w, b

    w1, b1 = linear(ks[0], ks[1], input_dimension, HIDDEN)
    w2, b2 = linear(ks[2], ks[3], HIDDEN, HIDDEN)
    w3, b3 = linear(ks[4], ks[5], HIDDEN, output_dimension)
    return (w1, b1, w2, b2, w3, b3)


def _reference(x, params, dtype=jnp.float32):
    """Pure-JAX reference; dtype=bfloat16 mimics the kernel's matmul casts."""
    w1, b1, w2, b2, w3, b3 = params

    def mm(a, w):
        return jnp.dot(a.astype(dtype), w.astype(dtype),
                       preferred_element_type=jnp.float32)

    h1 = jnp.maximum(mm(x, w1) + b1, 0.0)
    h2 = jnp.maximum(mm(h1, w2) + b2, 0.0)
    return mm(h2, w3) + b3


if __name__ == "__main__":
    input_dimension = 2    # maze state (x, y)
    output_dimension = 4   # action values (up, right, down, left)

    key = jax.random.PRNGKey(0)
    pkey, xk1, xk2 = jax.random.split(key, 3)
    params = init_params(pkey, input_dimension, output_dimension)
    forward = make_network_forward(params)

    # small case (matches the RL usage): batch=2, single grid step
    x_small = jax.random.uniform(xk1, (2, input_dimension), jnp.float32)
    out_small = jax.block_until_ready(forward(x_small))
    assert out_small.shape == (2, output_dimension)
    assert jnp.allclose(out_small, _reference(x_small, params, jnp.bfloat16),
                        atol=1e-3, rtol=1e-3), "bf16-ref mismatch (batch=2)"
    assert jnp.allclose(out_small, _reference(x_small, params, jnp.float32),
                        atol=1e-1, rtol=1e-1), "f32-ref mismatch (batch=2)"

    # larger batch exercises the auto-sized (and possibly 2-core) grid path
    x_big = jax.random.uniform(xk2, (300, input_dimension), jnp.float32)
    out_big = jax.block_until_ready(forward(x_big))
    assert out_big.shape == (300, output_dimension)
    assert jnp.allclose(out_big, _reference(x_big, params, jnp.bfloat16),
                        atol=1e-3, rtol=1e-3), "bf16-ref mismatch (batch=300)"
    assert jnp.allclose(out_big, _reference(x_big, params, jnp.float32),
                        atol=1e-1, rtol=1e-1), "f32-ref mismatch (batch=300)"

    print("KERNEL_OK")
</pallas_src>

<mosaic_0001>
module attributes {stable_mosaic.version = 11 : i64} {
  func.func @kernel(%arg0: i32, %arg1: memref<8x16xf32, #tpu.memory_space<vmem>>, %arg2: memref<272x128xbf16, #tpu.memory_space<vmem>>, %arg3: memref<8x128xf32, #tpu.memory_space<vmem>>, %arg4: memref<8x128xf32, #tpu.memory_space<vmem>>) attributes {dimension_semantics = [#tpu.dimension_semantics<parallel>], iteration_bounds = array<i64: 1>, scalar_prefetch = 0 : i64, scratch_operands = 0 : i64, tpu.core_type = #tpu.core_type<tc>, window_params = [{transform_indices = @transform_0, window_bounds = array<i64: 8, 16>}, {pipeline_mode = #tpu.pipeline_mode<synchronous>, transform_indices = @transform_1, window_bounds = array<i64: 272, 128>}, {pipeline_mode = #tpu.pipeline_mode<synchronous>, transform_indices = @transform_2, window_bounds = array<i64: 8, 128>}, {transform_indices = @transform_3, window_bounds = array<i64: 8, 128>}]} {
    %c0 = arith.constant 0 : index
    %c0_0 = arith.constant 0 : index
    %0 = vector.load %arg1[%c0, %c0_0] : memref<8x16xf32, #tpu.memory_space<vmem>>, vector<8x16xf32>
    %1 = arith.truncf %0 : vector<8x16xf32> to vector<8x16xbf16>
    %c0_1 = arith.constant 0 : index
    %c0_2 = arith.constant 0 : index
    %2 = vector.load %arg2[%c0_1, %c0_2] : memref<272x128xbf16, #tpu.memory_space<vmem>>, vector<16x128xbf16>
    %cst = arith.constant dense<0.000000e+00> : vector<8x128xf32>
    %3 = tpu.matmul %1, %2, %cst {dimension_numbers = #tpu.dot_dimension_numbers<[1], [0], [0], [1], [0, 0, 1, 1], [], []>} : vector<8x16xbf16>, vector<16x128xbf16>, vector<8x128xf32> -> vector<8x128xf32>
    %c0_3 = arith.constant 0 : index
    %c0_4 = arith.constant 0 : index
    %4 = vector.load %arg3[%c0_3, %c0_4] : memref<8x128xf32, #tpu.memory_space<vmem>>, vector<1x128xf32>
    %5 = vector.broadcast %4 : vector<1x128xf32> to vector<8x128xf32>
    %6 = arith.addf %3, %5 : vector<8x128xf32>
    %cst_5 = arith.constant 0.000000e+00 : f32
    %7 = vector.broadcast %cst_5 : f32 to vector<8x128xf32>
    %8 = arith.maximumf %6, %7 : vector<8x128xf32>
    %9 = arith.truncf %8 : vector<8x128xf32> to vector<8x128xbf16>
    %c16 = arith.constant 16 : index
    %c0_6 = arith.constant 0 : index
    %10 = vector.load %arg2[%c16, %c0_6] : memref<272x128xbf16, #tpu.memory_space<vmem>>, vector<128x128xbf16>
    %cst_7 = arith.constant dense<0.000000e+00> : vector<8x128xf32>
    %11 = tpu.matmul %9, %10, %cst_7 {dimension_numbers = #tpu.dot_dimension_numbers<[1], [0], [0], [1], [0, 0, 1, 1], [], []>} : vector<8x128xbf16>, vector<128x128xbf16>, vector<8x128xf32> -> vector<8x128xf32>
    %c1 = arith.constant 1 : index
    %c0_8 = arith.constant 0 : index
    %12 = vector.load %arg3[%c1, %c0_8] : memref<8x128xf32, #tpu.memory_space<vmem>>, vector<1x128xf32>
    %13 = vector.broadcast %12 : vector<1x128xf32> to vector<8x128xf32>
    %14 = arith.addf %11, %13 : vector<8x128xf32>
    %cst_9 = arith.constant 0.000000e+00 : f32
    %15 = vector.broadcast %cst_9 : f32 to vector<8x128xf32>
    %16 = arith.maximumf %14, %15 : vector<8x128xf32>
    %17 = arith.truncf %16 : vector<8x128xf32> to vector<8x128xbf16>
    %c144 = arith.constant 144 : index
    %c0_10 = arith.constant 0 : index
    %18 = vector.load %arg2[%c144, %c0_10] : memref<272x128xbf16, #tpu.memory_space<vmem>>, vector<128x128xbf16>
    %cst_11 = arith.constant dense<0.000000e+00> : vector<8x128xf32>
    %19 = tpu.matmul %17, %18, %cst_11 {dimension_numbers = #tpu.dot_dimension_numbers<[1], [0], [0], [1], [0, 0, 1, 1], [], []>} : vector<8x128xbf16>, vector<128x128xbf16>, vector<8x128xf32> -> vector<8x128xf32>
    %c2 = arith.constant 2 : index
    %c0_12 = arith.constant 0 : index
    %20 = vector.load %arg3[%c2, %c0_12] : memref<8x128xf32, #tpu.memory_space<vmem>>, vector<1x128xf32>
    %21 = vector.broadcast %20 : vector<1x128xf32> to vector<8x128xf32>
    %22 = arith.addf %19, %21 : vector<8x128xf32>
    %c0_13 = arith.constant 0 : index
    %c0_14 = arith.constant 0 : index
    %23 = vector.load %arg4[%c0_13, %c0_14] : memref<8x128xf32, #tpu.memory_space<vmem>>, vector<8x128xf32>
    tpu.vector_store %arg4[%c0_13, %c0_14], %22 {strides = array<i32>} : memref<8x128xf32, #tpu.memory_space<vmem>>, vector<8x128xf32>,
    return
  }
  func.func @transform_0(%arg0: i32) -> (i32, i32) {
    %c0_i32 = arith.constant 0 : i32
    %c0_i32_0 = arith.constant 0 : i32
    return %arg0, %c0_i32 : i32, i32
  }
  func.func @transform_1(%arg0: i32) -> (i32, i32) {
    %c0_i32 = arith.constant 0 : i32
    %c0_i32_0 = arith.constant 0 : i32
    %c0_i32_1 = arith.constant 0 : i32
    return %c0_i32, %c0_i32_0 : i32, i32
  }
  func.func @transform_2(%arg0: i32) -> (i32, i32) {
    %c0_i32 = arith.constant 0 : i32
    %c0_i32_0 = arith.constant 0 : i32
    %c0_i32_1 = arith.constant 0 : i32
    return %c0_i32, %c0_i32_0 : i32, i32
  }
  func.func @transform_3(%arg0: i32) -> (i32, i32) {
    %c0_i32 = arith.constant 0 : i32
    %c0_i32_0 = arith.constant 0 : i32
    return %arg0, %c0_i32 : i32, i32
  }
}

</mosaic_0001>

<bundles_post_ra>
// kernel: _fwd.1
= control target key start
LH: loop header
LB: loop body
LE: loop exit
PB: predicated region body
PF: predicated region fallthrough
CT: control target
= control target key end

     0   :  { %8 = vsyncpa [#allocation3], 0  ;;  %s449_s12 = smov [#allocation2]   ;;  %s521_s0 = inlined_call_operand.vmem [shape: f32[8,16], index: 0, kind: input, shape index: {}]   ;;  %s522_s1 = inlined_call_operand.hbm [shape: bf16[272,128], index: 1, kind: input, shape index: {}]   ;;  %s523_s2 = inlined_call_operand.vmem [shape: f32[8,128], index: 2, kind: input, shape index: {}]   ;;  %s524_s3 = inlined_call_operand.vmem [shape: f32[8,128], index: 3, kind: output, shape index: {}]  }
   0x1   :  { %s16_s13 = sshll.u32 %s449_s12, 4  ;;  %s425_s16 = scalar_lea.hbm %s522_s1, 2176  ;;  %s17_s13 = int_to_ptr.vmem [resolvable:$true] %s16_s13 }
   0x2   :  { %p426_p0 = scmp.ne.s32.totalorder %s522_s1, %s425_s16  ;;  %p429_p1 = scmp.lt.u32.totalorder %s425_s16, %s522_s1 }
   0x4   :  { %p431_p2 = pnand %p429_p1, %p426_p0 }
   0x6   :  { %434 = shalt.err (!%p431_p2)
}
   0x7   :  { %s435_s21 = scalar_lea.vmem %s17_s13, 2176  ;;  %p440_p4 = scmp.lt.s32.totalorder %s17_s13, %s17_s13 }
   0x8   :  { %p436_p3 = scmp.ne.s32.totalorder %s17_s13, %s435_s21  ;;  %p441_p5 = scmp.lt.s32.totalorder %s435_s21, %s435_s21 }
   0xa   :  { %p442_p6 = por %p441_p5, %p440_p4 }
   0xc   :  { %p443_p7 = pnand %p442_p6, %p436_p3 }
   0xe   :  { %446 = shalt.err (!%p443_p7)
}
   0xf   :  { %s450_s22 = smov 64   ;;  %s451_s23 = smov 4  }
  0x10   :  { %22 = dma.hbm_to_vmem [thread:$0]  %s522_s1, 2176, %s17_s13, [#allocation3], %s450_s22, %s450_s22, %s451_s23  }
  0x11   :  { %447 = dma.done.wait [#allocation3], 2176  }
  0x12   :  { %448 = vsyncadd [#allocation3], 4294965120  ;;  %v452_v0 = vmov 0.0   ;;  %vm453_vm0 = vmmov 0   ;;  %v408_v1 = vld [vmem:[#allocation2] sm:$0xff]   ;;  %v29_v2 = vld [vmem:[%s521_s0] sm:$0xff] }
  0x13   :  { %357 = vmatprep.subr.bf16.mxu0 %v452_v0  ;;  %359 = vmatprep.mubr.msk.bf16.mxu0 %vm453_vm0, %v452_v0  ;;  %v30_v3 = vpack.c.bf16 %v29_v2, %v29_v2  ;;  %vm44_vm1 = vcmask 130048   ;;  %v409_v4 = vld [vmem:[#allocation2 + $0x8] sm:$0xff]   ;;  %v410_v5 = vld [vmem:[#allocation2 + $0x10] sm:$0xff]   ;;  %v411_v6 = vld [vmem:[#allocation2 + $0x18] sm:$0xff]  }
  0x14   :  { %363 = vmatprep.subr.bf16.mxu1 %v452_v0  ;;  %379 = vmatprep.mubr.msk.bf16.mxu1 %vm453_vm0, %v452_v0  ;;  %v412_v7 = vld [vmem:[#allocation2 + $0x20] sm:$0xff]   ;;  %v413_v8 = vld [vmem:[#allocation2 + $0x28] sm:$0xff]   ;;  %v414_v9 = vld [vmem:[#allocation2 + $0x30] sm:$0xff]  }
  0x15   :  { %358 = vmatpush3.bf16.msra.mxu0 %v408_v1  ;;  %364 = vmatpush3.bf16.msra.mxu1 %v409_v4  ;;  %v415_v10 = vld [vmem:[#allocation2 + $0x38] sm:$0xff]   ;;  %v416_v11 = vld [vmem:[#allocation2 + $0x40] sm:$0xff]   ;;  %v417_v12 = vld [vmem:[#allocation2 + $0x48] sm:$0xff]  }
  0x16   :  { %383 = vmatprep.subr.bf16.mxu0 %v452_v0  ;;  %365 = vmatprep.subr.bf16.mxu1 %v452_v0  ;;  %v418_v13 = vld [vmem:[#allocation2 + $0x50] sm:$0xff]   ;;  %v419_v14 = vld [vmem:[#allocation2 + $0x58] sm:$0xff]   ;;  %v420_v15 = vld [vmem:[#allocation2 + $0x60] sm:$0xff]  }
  0x17   :  { %v421_v16 = vld [vmem:[#allocation2 + $0x68] sm:$0xff]   ;;  %v422_v17 = vld [vmem:[#allocation2 + $0x70] sm:$0xff]   ;;  %v316_v18 = vld [vmem:[%s523_s2] ss:$0 sm:$0xff] }
  0x18   :  { %360 = vmatmul.mubr.msk.bf16.vlgmr.msra.gmra.mrb[0].mxu0 %vm44_vm1, %v30_v3  ;;  %v423_v26 = vld [vmem:[#allocation2 + $0x78] sm:$0xff]   ;;  %v424_v27 = vld [vmem:[#allocation2 + $0x80] sm:$0xff]  }
  0x19   :  { %399 = vmatprep.mubr.msk.bf16.mxu0 %vm453_vm0, %v452_v0  ;;  %366 = vmatpush3.bf16.msra.mxu1 %v410_v5  ;;  %v319_v28 = vld [vmem:[%s523_s2 + $0x1] ss:$0 sm:$0xff]  ;;  %v328_v36 = vld [vmem:[%s523_s2 + $0x2] ss:$0 sm:$0xff] }
  0x1a   :  { %367 = vmatprep.subr.bf16.mxu1 %v452_v0  ;;  %384 = vmatpush3.bf16.msra.mxu0 %v417_v12 }
  0x1b   :  { %385 = vmatprep.subr.bf16.mxu0 %v452_v0 }
  0x1d   :  { %368 = vmatpush3.bf16.msra.mxu1 %v411_v6 }
  0x1e   :  { %369 = vmatprep.subr.bf16.mxu1 %v452_v0  ;;  %386 = vmatpush3.bf16.msra.mxu0 %v418_v13 }
  0x1f   :  { %387 = vmatprep.subr.bf16.mxu0 %v452_v0 }
  0x21   :  { %370 = vmatpush3.bf16.msra.mxu1 %v412_v7 }
  0x22   :  { %371 = vmatprep.subr.bf16.mxu1 %v452_v0  ;;  %388 = vmatpush3.bf16.msra.mxu0 %v419_v14 }
  0x23   :  { %389 = vmatprep.subr.bf16.mxu0 %v452_v0 }
  0x25   :  { %372 = vmatpush3.bf16.msra.mxu1 %v413_v8 }
  0x26   :  { %373 = vmatprep.subr.bf16.mxu1 %v452_v0  ;;  %390 = vmatpush3.bf16.msra.mxu0 %v420_v15 }
  0x27   :  { %391 = vmatprep.subr.bf16.mxu0 %v452_v0 }
  0x29   :  { %374 = vmatpush3.bf16.msra.mxu1 %v414_v9 }
  0x2a   :  { %375 = vmatprep.subr.bf16.mxu1 %v452_v0  ;;  %392 = vmatpush3.bf16.msra.mxu0 %v421_v16 }
  0x2b   :  { %393 = vmatprep.subr.bf16.mxu0 %v452_v0 }
  0x2d   :  { %376 = vmatpush3.bf16.msra.mxu1 %v415_v10 }
  0x2e   :  { %377 = vmatprep.subr.bf16.mxu1 %v452_v0  ;;  %394 = vmatpush3.bf16.msra.mxu0 %v422_v17 }
  0x2f   :  { %395 = vmatprep.subr.bf16.mxu0 %v452_v0 }
  0x31   :  { %378 = vmatpush3.bf16.msra.mxu1 %v416_v11 }
  0x32   :  { %396 = vmatpush3.bf16.msra.mxu0 %v423_v26 }
  0x33   :  { %397 = vmatprep.subr.bf16.mxu0 %v452_v0 }
  0x36   :  { %398 = vmatpush3.bf16.msra.mxu0 %v424_v27 }
  0xeb   :  { %v82_v19 = vpop.f32.mrb[0].mxu0 }
  0xec   :  { %v83_v20 = vadd.f32 %v316_v18, %v82_v19  ;;  %v361_v21 = vpop.f32.mrb[1].mxu0 }
  0xed   :  { %v85_v22 = vpop.f32.mrb[2].mxu0 }
  0xee   :  { %v88_v23 = vmax.f32 %v83_v20, 0.0  ;;  %v362_v24 = vpop.f32.mrb[3].mxu0 }
  0xf0   :  { %v89_v25 = vpack.c.bf16 %v88_v23, %v88_v23 }
  0xf2   :  { %380 = vmatmul.mubr.bf16.vlgmr.msra.gmra.mrb[0].mxu1 %v89_v25 }
 0x1c5   :  { %v193_v29 = vpop.f32.mrb[0].mxu1 }
 0x1c6   :  { %v194_v30 = vadd.f32 %v319_v28, %v193_v29  ;;  %v381_v31 = vpop.f32.mrb[1].mxu1 }
 0x1c7   :  { %v196_v32 = vpop.f32.mrb[2].mxu1 }
 0x1c8   :  { %v199_v33 = vmax.f32 %v194_v30, 0.0  ;;  %v382_v34 = vpop.f32.mrb[3].mxu1 }
 0x1ca   :  { %v200_v35 = vpack.c.bf16 %v199_v33, %v199_v33 }
 0x1cc   :  { %400 = vmatmul.mubr.bf16.vlgmr.msra.gmra.mrb[4].mxu0 %v200_v35 }
 0x29f   :  { %v304_v37 = vpop.f32.mrb[4].mxu0 }
 0x2a0   :  { %v305_v38 = vadd.f32 %v328_v36, %v304_v37  ;;  %v401_v39 = vpop.f32.mrb[5].mxu0 }
 0x2a1   :  { %v307_v40 = vpop.f32.mrb[6].mxu0 }
 0x2a2   :  { %310 = vst [vmem:[%s524_s3] sm:$0xff] %v305_v38  ;;  %v402_v41 = vpop.f32.mrb[7].mxu0 }
 0x2a3   :  { %315 = vsyncpa [#allocation3], 1 }

</bundles_post_ra>
